<compile_context>
chip_gen: v6e
topology: v6e:2x2x1
jax: 0.10.0
libtpu: 0.0.40
codegen_flags: <defaults>
</compile_context>

<pallas_src>
import jax
import jax.numpy as jnp
from jax.experimental import pallas as pl
from jax.experimental.pallas import tpu as pltpu

_LANE = 128


def _deepqnet_kernel(x_ref, w1_ref, b1_ref, w2_ref, b2_ref, w3_ref, b3_ref, o_ref):
    # Layer 1: Linear + ReLU  (bf16 MXU operands, f32 accumulate; bias + ReLU in f32 on VPU)
    x = x_ref[...].astype(jnp.bfloat16)
    h = jnp.dot(x, w1_ref[...], preferred_element_type=jnp.float32)
    h = jnp.maximum(h + b1_ref[...], 0.0)

    # Layer 2: Linear + ReLU
    h = jnp.dot(h.astype(jnp.bfloat16), w2_ref[...], preferred_element_type=jnp.float32)
    h = jnp.maximum(h + b2_ref[...], 0.0)

    # Layer 3: Linear (lane-padded output columns -> unmasked, lane-dense stores)
    h = jnp.dot(h.astype(jnp.bfloat16), w3_ref[...], preferred_element_type=jnp.float32)
    o_ref[...] = (h + b3_ref[...]).astype(o_ref.dtype)
    # TODO(synk): pack 128//n_actions batch rows per 128-lane output row (or fuse the DQN
    # argmax) to cut writeback a further ~30x; needs an in-kernel sublane->lane reshape.


def init_params(key, n_observations, no_nodes, n_actions):
    """Deterministic init mimicking torch.nn.Linear default (U[-1/sqrt(fan_in), ...]).
    Weights kept in torch layout (out_features, in_features), f32."""
    ks = jax.random.split(key, 6)

    def lin(kw, kb, fan_in, fan_out):
        bound = 1.0 / jnp.sqrt(jnp.float32(fan_in))
        w = jax.random.uniform(kw, (fan_out, fan_in), jnp.float32, -bound, bound)
        b = jax.random.uniform(kb, (fan_out,), jnp.float32, -bound, bound)
        return w, b

    w1, b1 = lin(ks[0], ks[1], n_observations, no_nodes)
    w2, b2 = lin(ks[2], ks[3], no_nodes, no_nodes)
    w3, b3 = lin(ks[4], ks[5], no_nodes, n_actions)
    return {"w1": w1, "b1": b1, "w2": w2, "b2": b2, "w3": w3, "b3": b3}


def _pad_to(n, m):
    return ((n + m - 1) // m) * m


def prepare_params(params, *, compute_dtype=jnp.bfloat16, lane=_LANE):
    """One-time layout fix: torch (out,in) weights -> (in,out) in compute_dtype; biases ->
    (1,out) f32; hidden width and action dim zero-padded to a multiple of `lane`.
    Pass compute_dtype=jnp.float32 if this forward also feeds TD targets and bf16 error matters."""
    n_obs = params["w1"].shape[1]
    H = params["w1"].shape[0]
    n_actions = params["w3"].shape[0]
    Hp = _pad_to(H, lane)
    Ap = _pad_to(n_actions, lane)

    def padded(mat, rows, cols):
        out = jnp.zeros((rows, cols), jnp.float32)
        return out.at[: mat.shape[0], : mat.shape[1]].set(mat)

    kparams = {
        "w1": padded(params["w1"].T, n_obs, Hp).astype(compute_dtype),
        "b1": padded(params["b1"].reshape(1, -1), 1, Hp),
        "w2": padded(params["w2"].T, Hp, Hp).astype(compute_dtype),
        "b2": padded(params["b2"].reshape(1, -1), 1, Hp),
        "w3": padded(params["w3"].T, Hp, Ap).astype(compute_dtype),
        "b3": padded(params["b3"].reshape(1, -1), 1, Ap),
    }
    return kparams, n_actions


def _deepqnet_dense(x, kp, n_actions):
    """Plain fused-dot path for tiny batches (a 1-step grid can't pipeline; launch overhead
    would dominate)."""
    f32 = jnp.float32
    h = jnp.maximum(x.astype(f32) @ kp["w1"].astype(f32) + kp["b1"], 0.0)
    h = jnp.maximum(h @ kp["w2"].astype(f32) + kp["b2"], 0.0)
    q = h @ kp["w3"].astype(f32) + kp["b3"]
    return q[:, :n_actions]


def _pick_batch_tile(B, tb, min_tiles):
    # Largest sublane-aligned (multiple-of-8) tile <= tb that still leaves >= min_tiles
    # grid steps, so the DMA/compute pipeline has depth and v7x megacore gets >= 2 tiles/core.
    target = min(tb, -(-B // min_tiles))
    return max(8, (target // 8) * 8)


def deepqnet_forward(x, kparams, n_actions, *, tb=1024, min_tiles=4, min_pallas_batch=256):
    """x: (B, n_observations), f32 or bf16. kparams: output of prepare_params."""
    B, n_obs = x.shape
    if B < min_pallas_batch:
        return _deepqnet_dense(x, kparams, n_actions)

    w1, b1 = kparams["w1"], kparams["b1"]
    w2, b2 = kparams["w2"], kparams["b2"]
    w3, b3 = kparams["w3"], kparams["b3"]
    Hp = w1.shape[1]                      # lane-padded hidden width (multiple of 128)
    Ap = w3.shape[1]                      # lane-padded action dim  (multiple of 128)

    TB = _pick_batch_tile(B, tb, min_tiles)
    grid = (pl.cdiv(B, TB),)
    Bp = grid[0] * TB
    xp = x if Bp == B else jnp.pad(x, ((0, Bp - B), (0, 0)))

    # Cost hint for XLA scheduling around the call.
    flops = 2 * Bp * (n_obs * Hp + Hp * Hp + Hp * Ap)
    weight_bytes = sum(a.size * a.dtype.itemsize for a in (w1, b1, w2, b2, w3, b3))
    bytes_accessed = xp.size * xp.dtype.itemsize + weight_bytes + Bp * Ap * 2   # bf16 out

    # Explicit VMEM budget: resident weights (single-buffered) + double-buffered x/out tiles
    # + f32 intermediates, with 2x headroom.  v7x has 64 MiB physical / 32 MiB scoped default.
    vmem_est = (weight_bytes
                + 2 * TB * n_obs * xp.dtype.itemsize
                + 2 * TB * Ap * 2
                + 3 * TB * max(Hp, Ap) * 4)
    vmem_limit = int(min(64 << 20, max(2 * vmem_est, 16 << 20)))

    resident = dict(pipeline_mode=pl.Buffered(1))   # constant blocks: no double-buffering

    out = pl.pallas_call(
        _deepqnet_kernel,
        out_shape=jax.ShapeDtypeStruct((Bp, Ap), jnp.bfloat16),
        grid=grid,
        in_specs=[
            pl.BlockSpec((TB, n_obs), lambda i: (i, 0)),               # streamed batch tiles
            pl.BlockSpec((n_obs, Hp), lambda i: (0, 0), **resident),   # VMEM-resident weights
            pl.BlockSpec((1, Hp), lambda i: (0, 0), **resident),
            pl.BlockSpec((Hp, Hp), lambda i: (0, 0), **resident),
            pl.BlockSpec((1, Hp), lambda i: (0, 0), **resident),
            pl.BlockSpec((Hp, Ap), lambda i: (0, 0), **resident),
            pl.BlockSpec((1, Ap), lambda i: (0, 0), **resident),
        ],
        out_specs=pl.BlockSpec((TB, Ap), lambda i: (i, 0)),
        compiler_params=pltpu.CompilerParams(
            dimension_semantics=("parallel",),       # megacore-shardable batch axis
            vmem_limit_bytes=vmem_limit,
        ),
        cost_estimate=pl.CostEstimate(
            flops=flops, transcendentals=0, bytes_accessed=bytes_accessed),
    )(xp, w1, b1, w2, b2, w3, b3)

    return out[:B, :n_actions].astype(jnp.float32)


def deepqnet_reference(x, params):
    """Pure-JAX f32 reference matching the torch forward (torch-layout params)."""
    h = jnp.maximum(x @ params["w1"].T + params["b1"], 0.0)
    h = jnp.maximum(h @ params["w2"].T + params["b2"], 0.0)
    return h @ params["w3"].T + params["b3"]


if __name__ == "__main__":
    n_observations = 16   # observation dim
    no_nodes = 32         # hidden width
    n_actions = 4

    key = jax.random.PRNGKey(0)
    kx, kx2, kp = jax.random.split(key, 3)

    params = init_params(kp, n_observations, no_nodes, n_actions)
    kparams, na = prepare_params(params)          # one-time layout fix / bf16 cast / lane pad

    # Pallas path: batch large enough to exercise the multi-tile, pipelined grid.
    batch = 1024
    x = jax.random.normal(kx, (batch, n_observations), jnp.float32)
    out = jax.block_until_ready(deepqnet_forward(x, kparams, na))
    ref = deepqnet_reference(x, params)
    assert out.shape == (batch, n_actions), out.shape
    # bf16 MXU operands / bf16 output slab with f32 accumulate -> ~1e-2 relative error.
    assert jnp.allclose(out, ref, atol=5e-2, rtol=5e-2), float(jnp.max(jnp.abs(out - ref)))

    # Tiny-batch path (fused-dot fallback; no pallas launch overhead).
    x2 = jax.random.normal(kx2, (2, n_observations), jnp.float32)
    out2 = jax.block_until_ready(deepqnet_forward(x2, kparams, na))
    ref2 = deepqnet_reference(x2, params)
    assert out2.shape == (2, n_actions), out2.shape
    assert jnp.allclose(out2, ref2, atol=5e-2, rtol=5e-2)

    print("KERNEL_OK")
</pallas_src>

<mosaic_0001>
module attributes {stable_mosaic.version = 11 : i64} {
  func.func @_deepqnet_kernel(%arg0: i32, %arg1: memref<256x16xf32, #tpu.memory_space<vmem>>, %arg2: memref<16x128xbf16, #tpu.memory_space<vmem>>, %arg3: memref<1x128xf32, #tpu.memory_space<vmem>>, %arg4: memref<128x128xbf16, #tpu.memory_space<vmem>>, %arg5: memref<1x128xf32, #tpu.memory_space<vmem>>, %arg6: memref<128x128xbf16, #tpu.memory_space<vmem>>, %arg7: memref<1x128xf32, #tpu.memory_space<vmem>>, %arg8: memref<256x128xbf16, #tpu.memory_space<vmem>>) attributes {dimension_semantics = [#tpu.dimension_semantics<parallel>], iteration_bounds = array<i64: 4>, scalar_prefetch = 0 : i64, scratch_operands = 0 : i64, tpu.core_type = #tpu.core_type<tc>, window_params = [{transform_indices = @transform_0, window_bounds = array<i64: 256, 16>}, {pipeline_mode = #tpu.pipeline_mode<synchronous>, transform_indices = @transform_1, window_bounds = array<i64: 16, 128>}, {pipeline_mode = #tpu.pipeline_mode<synchronous>, transform_indices = @transform_2, window_bounds = array<i64: 1, 128>}, {pipeline_mode = #tpu.pipeline_mode<synchronous>, transform_indices = @transform_3, window_bounds = array<i64: 128, 128>}, {pipeline_mode = #tpu.pipeline_mode<synchronous>, transform_indices = @transform_4, window_bounds = array<i64: 1, 128>}, {pipeline_mode = #tpu.pipeline_mode<synchronous>, transform_indices = @transform_5, window_bounds = array<i64: 128, 128>}, {pipeline_mode = #tpu.pipeline_mode<synchronous>, transform_indices = @transform_6, window_bounds = array<i64: 1, 128>}, {transform_indices = @transform_7, window_bounds = array<i64: 256, 128>}]} {
    %c0 = arith.constant 0 : index
    %c0_0 = arith.constant 0 : index
    %0 = vector.load %arg1[%c0, %c0_0] : memref<256x16xf32, #tpu.memory_space<vmem>>, vector<256x16xf32>
    %1 = arith.truncf %0 : vector<256x16xf32> to vector<256x16xbf16>
    %c0_1 = arith.constant 0 : index
    %c0_2 = arith.constant 0 : index
    %2 = vector.load %arg2[%c0_1, %c0_2] : memref<16x128xbf16, #tpu.memory_space<vmem>>, vector<16x128xbf16>
    %cst = arith.constant dense<0.000000e+00> : vector<256x128xf32>
    %3 = tpu.matmul %1, %2, %cst {dimension_numbers = #tpu.dot_dimension_numbers<[1], [0], [0], [1], [0, 0, 1, 1], [], []>} : vector<256x16xbf16>, vector<16x128xbf16>, vector<256x128xf32> -> vector<256x128xf32>
    %c0_3 = arith.constant 0 : index
    %c0_4 = arith.constant 0 : index
    %4 = vector.load %arg3[%c0_3, %c0_4] : memref<1x128xf32, #tpu.memory_space<vmem>>, vector<1x128xf32>
    %5 = vector.broadcast %4 : vector<1x128xf32> to vector<256x128xf32>
    %6 = arith.addf %3, %5 : vector<256x128xf32>
    %cst_5 = arith.constant 0.000000e+00 : f32
    %7 = vector.broadcast %cst_5 : f32 to vector<256x128xf32>
    %8 = arith.maximumf %6, %7 : vector<256x128xf32>
    %9 = arith.truncf %8 : vector<256x128xf32> to vector<256x128xbf16>
    %c0_6 = arith.constant 0 : index
    %c0_7 = arith.constant 0 : index
    %10 = vector.load %arg4[%c0_6, %c0_7] : memref<128x128xbf16, #tpu.memory_space<vmem>>, vector<128x128xbf16>
    %cst_8 = arith.constant dense<0.000000e+00> : vector<256x128xf32>
    %11 = tpu.matmul %9, %10, %cst_8 {dimension_numbers = #tpu.dot_dimension_numbers<[1], [0], [0], [1], [0, 0, 1, 1], [], []>} : vector<256x128xbf16>, vector<128x128xbf16>, vector<256x128xf32> -> vector<256x128xf32>
    %c0_9 = arith.constant 0 : index
    %c0_10 = arith.constant 0 : index
    %12 = vector.load %arg5[%c0_9, %c0_10] : memref<1x128xf32, #tpu.memory_space<vmem>>, vector<1x128xf32>
    %13 = vector.broadcast %12 : vector<1x128xf32> to vector<256x128xf32>
    %14 = arith.addf %11, %13 : vector<256x128xf32>
    %cst_11 = arith.constant 0.000000e+00 : f32
    %15 = vector.broadcast %cst_11 : f32 to vector<256x128xf32>
    %16 = arith.maximumf %14, %15 : vector<256x128xf32>
    %17 = arith.truncf %16 : vector<256x128xf32> to vector<256x128xbf16>
    %c0_12 = arith.constant 0 : index
    %c0_13 = arith.constant 0 : index
    %18 = vector.load %arg6[%c0_12, %c0_13] : memref<128x128xbf16, #tpu.memory_space<vmem>>, vector<128x128xbf16>
    %cst_14 = arith.constant dense<0.000000e+00> : vector<256x128xf32>
    %19 = tpu.matmul %17, %18, %cst_14 {dimension_numbers = #tpu.dot_dimension_numbers<[1], [0], [0], [1], [0, 0, 1, 1], [], []>} : vector<256x128xbf16>, vector<128x128xbf16>, vector<256x128xf32> -> vector<256x128xf32>
    %c0_15 = arith.constant 0 : index
    %c0_16 = arith.constant 0 : index
    %20 = vector.load %arg7[%c0_15, %c0_16] : memref<1x128xf32, #tpu.memory_space<vmem>>, vector<1x128xf32>
    %21 = vector.broadcast %20 : vector<1x128xf32> to vector<256x128xf32>
    %22 = arith.addf %19, %21 : vector<256x128xf32>
    %23 = arith.truncf %22 : vector<256x128xf32> to vector<256x128xbf16>
    %c0_17 = arith.constant 0 : index
    %c0_18 = arith.constant 0 : index
    %24 = vector.load %arg8[%c0_17, %c0_18] : memref<256x128xbf16, #tpu.memory_space<vmem>>, vector<256x128xbf16>
    tpu.vector_store %arg8[%c0_17, %c0_18], %23 {strides = array<i32>} : memref<256x128xbf16, #tpu.memory_space<vmem>>, vector<256x128xbf16>,
    return
  }
  func.func @transform_0(%arg0: i32) -> (i32, i32) {
    %c0_i32 = arith.constant 0 : i32
    %c0_i32_0 = arith.constant 0 : i32
    return %arg0, %c0_i32 : i32, i32
  }
  func.func @transform_1(%arg0: i32) -> (i32, i32) {
    %c0_i32 = arith.constant 0 : i32
    %c0_i32_0 = arith.constant 0 : i32
    %c0_i32_1 = arith.constant 0 : i32
    return %c0_i32, %c0_i32_0 : i32, i32
  }
  func.func @transform_2(%arg0: i32) -> (i32, i32) {
    %c0_i32 = arith.constant 0 : i32
    %c0_i32_0 = arith.constant 0 : i32
    %c0_i32_1 = arith.constant 0 : i32
    return %c0_i32, %c0_i32_0 : i32, i32
  }
  func.func @transform_3(%arg0: i32) -> (i32, i32) {
    %c0_i32 = arith.constant 0 : i32
    %c0_i32_0 = arith.constant 0 : i32
    %c0_i32_1 = arith.constant 0 : i32
    return %c0_i32, %c0_i32_0 : i32, i32
  }
  func.func @transform_4(%arg0: i32) -> (i32, i32) {
    %c0_i32 = arith.constant 0 : i32
    %c0_i32_0 = arith.constant 0 : i32
    %c0_i32_1 = arith.constant 0 : i32
    return %c0_i32, %c0_i32_0 : i32, i32
  }
  func.func @transform_5(%arg0: i32) -> (i32, i32) {
    %c0_i32 = arith.constant 0 : i32
    %c0_i32_0 = arith.constant 0 : i32
    %c0_i32_1 = arith.constant 0 : i32
    return %c0_i32, %c0_i32_0 : i32, i32
  }
  func.func @transform_6(%arg0: i32) -> (i32, i32) {
    %c0_i32 = arith.constant 0 : i32
    %c0_i32_0 = arith.constant 0 : i32
    %c0_i32_1 = arith.constant 0 : i32
    return %c0_i32, %c0_i32_0 : i32, i32
  }
  func.func @transform_7(%arg0: i32) -> (i32, i32) {
    %c0_i32 = arith.constant 0 : i32
    %c0_i32_0 = arith.constant 0 : i32
    return %arg0, %c0_i32 : i32, i32
  }
}

</mosaic_0001>

<bundles_post_ra>
// kernel: tpu_custom_call.1
= control target key start
LH: loop header
LB: loop body
LE: loop exit
PB: predicated region body
PF: predicated region fallthrough
CT: control target
= control target key end

     0   :  { %12 = vsyncpa [#allocation3], 0  ;;  %s2269_s0 = inlined_call_operand.vmem [shape: f32[1024,16], index: 0, kind: input, shape index: {}]   ;;  %s2270_s1 = inlined_call_operand.vmem [shape: bf16[16,128], index: 1, kind: input, shape index: {}]   ;;  %s2271_s2 = inlined_call_operand.vmem [shape: f32[1,128], index: 2, kind: input, shape index: {}]   ;;  %s2272_s3 = inlined_call_operand.vmem [shape: bf16[128,128], index: 3, kind: input, shape index: {}]   ;;  %s2273_s4 = inlined_call_operand.vmem [shape: f32[1,128], index: 4, kind: input, shape index: {}]   ;;  %s2274_s5 = inlined_call_operand.vmem [shape: bf16[128,128], index: 5, kind: input, shape index: {}]   ;;  %s2275_s6 = inlined_call_operand.vmem [shape: f32[1,128], index: 6, kind: input, shape index: {}]   ;;  %s2276_s7 = inlined_call_operand.hbm [shape: bf16[1024,128], index: 7, kind: output, shape index: {}]  }
   0x1   :  { %14 = vsyncpa [#allocation3 + $0x1], 0  ;;  %s1918_s24 = smov 0   ;;  %s1920_s25 = smov 0  }
   0x2   :  { %s1922_s26 = smov 0   ;;  %s1924_s27 = smov 0  }
   0x3 LB: > { %s1939_s28 = sadd.s32 4294967295, %s1873_s27   ;;  %s1350_s29 = sadd.s32 4294967294, %s1873_s27   ;;  %s1873_s27 = sphi %s1924_s27, %s2282_s27   ;;  %s1869_s26 = sphi %s1922_s26, %s2281_s26   ;;  %s1865_s25 = sphi %s1920_s25, %s2280_s25   ;;  %s1861_s24 = sphi %s1918_s24, %s2279_s24  }
   0x4   : > { %s1943_s30 = sadd.s32 1, %s1873_s27   ;;  %s179_s8 = sadd.s32 1, %s1869_s26 }
   0x5   : > { %s176_s9 = ssub.s32 %s1873_s27, %s1943_s30  ;;  %p189_p0 = scmp.ne.s32.totalorder %s1869_s26, %s1865_s25 }
   0x6   : > { %p177_p1 = scmp.eq.s32.totalorder %s176_s9, 0  ;;  %p190_p2 = scmp.eq.s32.totalorder %s1939_s28, 3 }
   0x7   : > { %p195_p3 = scmp.ne.s32.totalorder %s1865_s25, %s1861_s24  ;;  %p196_p4 = scmp.eq.s32.totalorder %s1350_s29, 3 }
   0x8   : > { %s1954_s10 = scalar_select %p177_p1, %s1869_s26, %s179_s8  }
   0x9   : > { %p1956_p5 = por %p190_p2, %p189_p0  ;;  %p1960_p6 = por %p196_p4, %p195_p3 }
   0xa   : > { %p1353_p7 = scmp.ge.s32.totalorder %s1873_s27, 1  ;;  %p241_p8 = scmp.lt.s32.totalorder %s1873_s27, 5 }
   0xc   : > { %p242_p9 = pnand %p1353_p7, %p241_p8 }
   0xd   : > { %s1355_s15 = sshll.u32 (!%p242_p9), %s1939_s28, 5  ;;  %s270_s14 = sand.u32 (!%p242_p9), 1, %s1865_s25  }
   0xe   : > { %245 = sbr.rel (%p242_p9) target bundleno = 711 (0x2c7), region = 48  ;;  %p274_p10 = scmp.lt.s32.totalorder (!%p242_p9), %s1355_s15, 127 }
   0xf   : > { %s1354_s17 = sshll.u32 (!%p242_p9), %s270_s14, 7  ;;  %s1462_s19 = sshll.u32 (!%p242_p9), %s1939_s28, 11 }
  0x10   : > { %s2221_s23 = scalar_lea.hbm (!%p242_p9), %s2276_s7, %s1462_s19  ;;  %s2229_s28 = scalar_lea.sflag (!%p242_p9), [#allocation3], %s270_s14 }
  0x11   : > { %s1875_s8 = smov (!%p242_p9), [#allocation2]  }
  0x12   : > { %s1817_s9 = sshll.u32 (!%p242_p9), %s1875_s8, 4  ;;  %s1818_s9 = int_to_ptr.vmem [resolvable:$false] %s1817_s9 }
  0x13   : > { %v1796_v0 = vld [vmem:[%s2270_s1] sm:$0xff]   ;;  %v1797_v1 = vld [vmem:[%s2272_s3 + $0x38] sm:$0xff]   ;;  %s2284_s15 = smov (!%p274_p10, %s1355_s15), 127  ;;  %vm344_vm0 = vcmask 130048   ;;  %v1798_v23 = vld [vmem:[%s2272_s3 + $0x30] sm:$0xff]   ;;  %s1819_s13 = scalar_lea.vmem %s1818_s9, 4096 }
  0x14   : > { %1623 = vmatprep.subr.bf16.mxu0 %v1796_v0  ;;  %1753 = vmatprep.subr.bf16.mxu1 %v1796_v0  ;;  %s1356_s18 = sshll.u32 %s2284_s15, 3  ;;  %v1799_v29 = vld [vmem:[%s2272_s3 + $0x28] sm:$0xff]   ;;  %v1800_v37 = vld [vmem:[%s2272_s3 + $0x20] sm:$0xff]   ;;  %v1801_v45 = vld [vmem:[%s2272_s3 + $0x18] sm:$0xff]  }
  0x15   : > { %1624 = vmatpush3.bf16.msra.mxu0 %v1796_v0  ;;  %1754 = vmatpush3.bf16.msra.mxu1 %v1796_v0  ;;  %s1976_s21 = scalar_lea.vmem %s2269_s0, %s1356_s18  ;;  %v1802_v54 = vld [vmem:[%s2272_s3 + $0x10] sm:$0xff]   ;;  %v1803_v55 = vld [vmem:[%s2272_s3 + $0x8] sm:$0xff]   ;;  %v1804_v56 = vld [vmem:[%s2272_s3] sm:$0xff]   ;;  %s2172_s18 = scalar_lea.vmem [#allocation2], %s1354_s17 }
  0x16   : > { %1657 = vmatprep.subr.bf16.mxu1 %v1797_v1  ;;  %v281_v2 = vld [vmem:[%s1976_s21] sm:$0xff]  ;;  %v282_v3 = vld [vmem:[%s1976_s21 + $0x8] sm:$0xff]  ;;  %v283_v4 = vld [vmem:[%s1976_s21 + $0x10] sm:$0xff]  ;;  %s1288_s20 = sshll.u32 %s2172_s18, 4  ;;  %s2223_s20 = int_to_ptr.vmem [resolvable:$true] %s1288_s20 }
  0x17   : > { %v313_v5 = vpack.c.bf16 %v282_v3, %v281_v2  ;;  %v284_v6 = vld [vmem:[%s1976_s21 + $0x18] sm:$0xff]  ;;  %v285_v7 = vld [vmem:[%s1976_s21 + $0x20] sm:$0xff]  ;;  %v286_v8 = vld [vmem:[%s1976_s21 + $0x28] sm:$0xff]  ;;  %s1813_s29 = scalar_lea.vmem %s2223_s20, 2048  ;;  %p1820_p0 = scmp.lt.s32.totalorder %s2223_s20, %s1818_s9 }
  0x18   : > { %v314_v9 = vpack.c.bf16 %v284_v6, %v283_v4  ;;  %v315_v10 = vpack.c.bf16 %v286_v8, %v285_v7  ;;  %v287_v11 = vld [vmem:[%s1976_s21 + $0x30] sm:$0xff]  ;;  %v288_v12 = vld [vmem:[%s1976_s21 + $0x38] sm:$0xff]  ;;  %v289_v13 = vld [vmem:[%s1976_s21 + $0x40] sm:$0xff]  ;;  %p1814_p11 = scmp.ne.s32.totalorder %s2223_s20, %s1813_s29  ;;  %p1821_p1 = scmp.lt.s32.totalorder %s1819_s13, %s1813_s29 }
  0x19   : > { %1625 = vmatprep.mubr.msk.bf16.mxu0 %vm344_vm0, %v313_v5  ;;  %v290_v14 = vld [vmem:[%s1976_s21 + $0x48] sm:$0xff]  ;;  %v297_v15 = vld [vmem:[%s1976_s21 + $0x80] sm:$0xff]  ;;  %v299_v18 = vld [vmem:[%s1976_s21 + $0x90] sm:$0xff]  ;;  %v316_v24 = vpack.c.bf16 %v288_v12, %v287_v11 }
  0x1a   : > { %1626 = vmatmul.mubr.msk.bf16.vlgmr.msra.gmra.mxu0 %vm344_vm0, %v314_v9  ;;  %v298_v16 = vld [vmem:[%s1976_s21 + $0x88] sm:$0xff]  ;;  %v300_v19 = vld [vmem:[%s1976_s21 + $0x98] sm:$0xff]  ;;  %v301_v20 = vld [vmem:[%s1976_s21 + $0xa0] sm:$0xff]  ;;  %v317_v26 = vpack.c.bf16 %v290_v14, %v289_v13  ;;  %p1815_p12 = pnand %p1814_p11, %p1956_p5  ;;  %p1822_p2 = por %p1821_p1, %p1820_p0 }
  0x1b   : > { %1629 = vmatprep.mubr.msk.bf16.mxu0 %vm344_vm0, %v315_v10  ;;  %v321_v17 = vpack.c.bf16 %v298_v16, %v297_v15  ;;  %v322_v21 = vpack.c.bf16 %v300_v19, %v299_v18  ;;  %v302_v22 = vld [vmem:[%s1976_s21 + $0xa8] sm:$0xff]  ;;  %v303_v27 = vld [vmem:[%s1976_s21 + $0xb0] sm:$0xff]  ;;  %v304_v28 = vld [vmem:[%s1976_s21 + $0xb8] sm:$0xff] }
  0x1c   : > { %v323_v25 = vpack.c.bf16 %v302_v22, %v301_v20  ;;  %v305_v30 = vld [vmem:[%s1976_s21 + $0xc0] sm:$0xff]  ;;  %v306_v31 = vld [vmem:[%s1976_s21 + $0xc8] sm:$0xff]  ;;  %v291_v32 = vld [vmem:[%s1976_s21 + $0x50] sm:$0xff]  ;;  %v324_v36 = vpack.c.bf16 %v304_v28, %v303_v27  ;;  %p1816_p13 = pneg %p1815_p12 }
  0x1d   : > { %1641 = vmatprep.mubr.msk.bf16.mxu1 %vm344_vm0, %v321_v17  ;;  %v292_v33 = vld [vmem:[%s1976_s21 + $0x58] sm:$0xff]  ;;  %v293_v34 = vld [vmem:[%s1976_s21 + $0x60] sm:$0xff]  ;;  %v294_v35 = vld [vmem:[%s1976_s21 + $0x68] sm:$0xff]  ;;  %v325_v38 = vpack.c.bf16 %v306_v31, %v305_v30 }
  0x1e   : > { %1642 = vmatmul.mubr.msk.bf16.vlgmr.msra.gmra.mxu1 %vm344_vm0, %v322_v21  ;;  %v318_v39 = vpack.c.bf16 %v292_v33, %v291_v32  ;;  %v319_v40 = vpack.c.bf16 %v294_v35, %v293_v34  ;;  %v307_v41 = vld [vmem:[%s1976_s21 + $0xd0] sm:$0xff]  ;;  %v308_v42 = vld [vmem:[%s1976_s21 + $0xd8] sm:$0xff]  ;;  %v309_v43 = vld [vmem:[%s1976_s21 + $0xe0] sm:$0xff]  ;;  %p1823_p3 = pnand %p1822_p2, %p1816_p13 }
  0x1f   : > { %1645 = vmatprep.mubr.msk.bf16.mxu1 %vm344_vm0, %v323_v25  ;;  %1658 = vmatpush3.bf16.msra.mxu1 %v1797_v1  ;;  %v310_v44 = vld [vmem:[%s1976_s21 + $0xe8] sm:$0xff]  ;;  %v295_v46 = vld [vmem:[%s1976_s21 + $0x70] sm:$0xff]  ;;  %v296_v47 = vld [vmem:[%s1976_s21 + $0x78] sm:$0xff]  ;;  %v326_v48 = vpack.c.bf16 %v308_v42, %v307_v41 }
  0x20   : > { %1659 = vmatprep.subr.bf16.mxu1 %v1798_v23  ;;  %v327_v49 = vpack.c.bf16 %v310_v44, %v309_v43  ;;  %v320_v50 = vpack.c.bf16 %v296_v47, %v295_v46  ;;  %v311_v51 = vld [vmem:[%s1976_s21 + $0xf0] sm:$0xff]  ;;  %v312_v52 = vld [vmem:[%s1976_s21 + $0xf8] sm:$0xff]  ;;  %v1807_v59 = vld [vmem:[%s2274_s5 + $0x28] sm:$0xff]  }
  0x21   : > { %v328_v53 = vpack.c.bf16 %v312_v52, %v311_v51  ;;  %v1805_v57 = vld [vmem:[%s2274_s5 + $0x38] sm:$0xff]   ;;  %v1806_v58 = vld [vmem:[%s2274_s5 + $0x30] sm:$0xff]   ;;  %v1808_v60 = vld [vmem:[%s2274_s5 + $0x20] sm:$0xff]  }
  0x22   : > { %1630 = vmatmul.mubr.msk.bf16.gmra.mxu0 %vm344_vm0, %v316_v24  ;;  %1705 = vmatprep.subr.bf16.mxu0 %v1805_v57  ;;  %v1809_v61 = vld [vmem:[%s2274_s5 + $0x18] sm:$0xff]   ;;  %v2065_v0 = vld [vmem:[%s2271_s2] ss:$0 sm:$0xff] }
  0x23   : > { %1633 = vmatprep.mubr.msk.bf16.mxu0 %vm344_vm0, %v317_v26  ;;  %1660 = vmatpush3.bf16.msra.mxu1 %v1798_v23 }
  0x24   : > { %1661 = vmatprep.subr.bf16.mxu1 %v1799_v29  ;;  %1706 = vmatpush3.bf16.msra.mxu0 %v1805_v57 }
  0x25   : > { %1707 = vmatprep.subr.bf16.mxu0 %v1806_v58 }
  0x26   : > { %1646 = vmatmul.mubr.msk.bf16.gmra.mxu1 %vm344_vm0, %v324_v36 }
  0x27   : > { %1649 = vmatprep.mubr.msk.bf16.mxu1 %vm344_vm0, %v325_v38  ;;  %1662 = vmatpush3.bf16.msra.mxu1 %v1799_v29 }
  0x28   : > { %1663 = vmatprep.subr.bf16.mxu1 %v1800_v37  ;;  %1708 = vmatpush3.bf16.msra.mxu0 %v1806_v58 }
  0x29   : > { %1709 = vmatprep.subr.bf16.mxu0 %v1807_v59 }
  0x2a   : > { %1634 = vmatmul.mubr.msk.bf16.gmra.mxu0 %vm344_vm0, %v318_v39 }
  0x2b   : > { %1637 = vmatprep.mubr.msk.bf16.mxu0 %vm344_vm0, %v319_v40  ;;  %1664 = vmatpush3.bf16.msra.mxu1 %v1800_v37 }
  0x2c   : > { %1665 = vmatprep.subr.bf16.mxu1 %v1801_v45  ;;  %1710 = vmatpush3.bf16.msra.mxu0 %v1807_v59 }
  0x2d   : > { %1711 = vmatprep.subr.bf16.mxu0 %v1808_v60 }
  0x2e   : > { %1650 = vmatmul.mubr.msk.bf16.gmra.mxu1 %vm344_vm0, %v326_v48 }
  0x2f   : > { %1653 = vmatprep.mubr.msk.bf16.mxu1 %vm344_vm0, %v327_v49  ;;  %1666 = vmatpush3.bf16.msra.mxu1 %v1801_v45 }
  0x30   : > { %1667 = vmatprep.subr.bf16.mxu1 %v1802_v54  ;;  %1712 = vmatpush3.bf16.msra.mxu0 %v1808_v60 }
  0x31   : > { %1713 = vmatprep.subr.bf16.mxu0 %v1809_v61 }
  0x32   : > { %1638 = vmatmul.mubr.msk.bf16.gmra.mxu0 %vm344_vm0, %v320_v50 }
  0x33   : > { %1668 = vmatpush3.bf16.msra.mxu1 %v1802_v54 }
  0x34   : > { %1669 = vmatprep.subr.bf16.mxu1 %v1803_v55  ;;  %1714 = vmatpush3.bf16.msra.mxu0 %v1809_v61 }
  0x36   : > { %1654 = vmatmul.mubr.msk.bf16.gmra.mxu1 %vm344_vm0, %v328_v53 }
  0x37   : > { %1670 = vmatpush3.bf16.msra.mxu1 %v1803_v55 }
  0x38   : > { %1671 = vmatprep.subr.bf16.mxu1 %v1804_v56 }
  0x3b   : > { %1672 = vmatpush3.bf16.msra.mxu1 %v1804_v56 }
  0xda   : > { %v1627_v62 = vpop.f32.mrf.mxu0 }
  0xdb   : > { %v436_v5 = vadd.f32 %v1627_v62, %v2065_v0 }
  0xdc   : > { %v427_v63 = vpop.f32.mrf.mxu0 }
  0xdd   : > { %v428_v2 = vadd.f32 %v2065_v0, %v427_v63  ;;  %v556_v14 = vmax.f32 %v436_v5, 0.0 }
  0xde   : > { %v1628_v1 = vpop.f32.mrf.mxu0  ;;  %v2069_v4 = vpop.f32.mrf.mxu1 }
  0xdf   : > { %v439_v3 = vadd.f32 %v1628_v1, %v2065_v0  ;;  %v554_v11 = vmax.f32 %v428_v2, 0.0 }
  0xe0   : > { %v430_v6 = vpop.f32.mrf.mxu0  ;;  %v491_v8 = vpop.f32.mrf.mxu1 }
  0xe1   : > { %v431_v7 = vadd.f32 %v2065_v0, %v430_v6  ;;  %v557_v9 = vmax.f32 %v439_v3, 0.0  ;;  %v492_v52 = vadd.f32 %v2065_v0, %v491_v8 }
  0xe2   : > { %v1631_v10 = vpop.f32.mrf.mxu0  ;;  %v2073_v13 = vpop.f32.mrf.mxu1 }
  0xe3   : > { %v555_v12 = vmax.f32 %v431_v7, 0.0  ;;  %v587_v18 = vpack.c.bf16 %v557_v9, %v556_v14  ;;  %v452_v23 = vadd.f32 %v1631_v10, %v2065_v0  ;;  %v570_v61 = vmax.f32 %v492_v52, 0.0  ;;  %v2126_v52 = vld [vmem:[%s2273_s4] ss:$0 sm:$0xff] }
  0xe4   : > { %v443_v15 = vpop.f32.mrf.mxu0  ;;  %v494_v17 = vpop.f32.mrf.mxu1  ;;  %v503_v14 = vadd.f32 %v2073_v13, %v2065_v0 }
  0xe5   : > { %v586_v16 = vpack.c.bf16 %v555_v12, %v554_v11  ;;  %v444_v20 = vadd.f32 %v2065_v0, %v443_v15  ;;  %v560_v32 = vmax.f32 %v452_v23, 0.0  ;;  %v495_v53 = vadd.f32 %v2065_v0, %v494_v17 }
  0xe6   : > { %v1632_v19 = vpop.f32.mrf.mxu0  ;;  %v2077_v22 = vpop.f32.mrf.mxu1  ;;  %v500_v11 = vadd.f32 %v2069_v4, %v2065_v0 }
  0xe7   : > { %v455_v21 = vadd.f32 %v1632_v19, %v2065_v0  ;;  %1673 = vmatprep.mubr.bf16.mxu1 %v586_v16  ;;  %v558_v29 = vmax.f32 %v444_v20, 0.0  ;;  %v571_v63 = vmax.f32 %v495_v53, 0.0  ;;  %v573_v19 = vmax.f32 %v503_v14, 0.0 }
  0xe8   : > { %v446_v24 = vpop.f32.mrf.mxu0  ;;  %1674 = vmatmul.mubr.bf16.vlgmr.msra.gmra.mxu1 %v587_v18  ;;  %v507_v26 = vpop.f32.mrf.mxu1  ;;  %v572_v18 = vmax.f32 %v500_v11, 0.0  ;;  %v516_v4 = vadd.f32 %v2077_v22, %v2065_v0 }
  0xe9   : > { %v447_v25 = vadd.f32 %v2065_v0, %v446_v24  ;;  %v561_v27 = vmax.f32 %v455_v21, 0.0  ;;  %v594_v8 = vpack.c.bf16 %v571_v63, %v570_v61  ;;  %v508_v9 = vadd.f32 %v2065_v0, %v507_v26 }
  0xea   : > { %v1635_v28 = vpop.f32.mrf.mxu0  ;;  %v2081_v31 = vpop.f32.mrf.mxu1 }
  0xeb   : > { %v559_v30 = vmax.f32 %v447_v25, 0.0  ;;  %v589_v36 = vpack.c.bf16 %v561_v27, %v560_v32  ;;  %v468_v41 = vadd.f32 %v1635_v28, %v2065_v0  ;;  %v574_v16 = vmax.f32 %v508_v9, 0.0 }
  0xec   : > { %v459_v33 = vpop.f32.mrf.mxu0  ;;  %v510_v35 = vpop.f32.mrf.mxu1  ;;  %v595_v25 = vpack.c.bf16 %v573_v19, %v572_v18  ;;  %v519_v13 = vadd.f32 %v2081_v31, %v2065_v0 }
  0xed   : > { %v588_v34 = vpack.c.bf16 %v559_v30, %v558_v29  ;;  %v460_v38 = vadd.f32 %v2065_v0, %v459_v33  ;;  %v564_v49 = vmax.f32 %v468_v41, 0.0  ;;  %v511_v10 = vadd.f32 %v2065_v0, %v510_v35 }
  0xee   : > { %v1636_v37 = vpop.f32.mrf.mxu0  ;;  %v2085_v40 = vpop.f32.mrf.mxu1  ;;  %v576_v29 = vmax.f32 %v516_v4, 0.0  ;;  %v577_v30 = vmax.f32 %v519_v13, 0.0 }
  0xef   : > { %v471_v39 = vadd.f32 %v1636_v37, %v2065_v0  ;;  %1677 = vmatprep.mubr.bf16.mxu1 %v588_v34  ;;  %v562_v47 = vmax.f32 %v460_v38, 0.0  ;;  %v575_v17 = vmax.f32 %v511_v10, 0.0  ;;  %v532_v22 = vadd.f32 %v2085_v40, %v2065_v0  ;;  %v1810_v40 = vld [vmem:[%s2274_s5 + $0x10] sm:$0xff]  }
  0xf0   : > { %v462_v42 = vpop.f32.mrf.mxu0  ;;  %1678 = vmatmul.mubr.bf16.gmra.mxu1 %v589_v36  ;;  %v523_v46 = vpop.f32.mrf.mxu1  ;;  %v597_v36 = vpack.c.bf16 %v577_v30, %v576_v29  ;;  %1715 = vmatprep.subr.bf16.mxu0 %v1810_v40 }
  0xf1   : > { %v463_v43 = vadd.f32 %v2065_v0, %v462_v42  ;;  %v565_v44 = vmax.f32 %v471_v39, 0.0  ;;  %v596_v21 = vpack.c.bf16 %v575_v17, %v574_v16  ;;  %v524_v23 = vadd.f32 %v2065_v0, %v523_v46  ;;  %1716 = vmatpush3.bf16.msra.mxu0 %v1810_v40 }
  0xf2   : > { %v1639_v45 = vpop.f32.mrf.mxu0  ;;  %v1652_v56 = vpop.f32.mrf.mxu1  ;;  %v580_v39 = vmax.f32 %v532_v22, 0.0 }
  0xf3   : > { %v563_v48 = vmax.f32 %v463_v43, 0.0  ;;  %v591_v54 = vpack.c.bf16 %v565_v44, %v564_v49  ;;  %v484_v59 = vadd.f32 %v1639_v45, %v2065_v0  ;;  %v578_v27 = vmax.f32 %v524_v23, 0.0  ;;  %v1811_v49 = vld [vmem:[%s2274_s5 + $0x8] sm:$0xff]  }
  0xf4   : > { %v475_v50 = vpop.f32.mrf.mxu0  ;;  %v526_v2 = vpop.f32.mrf.mxu1  ;;  %v535_v37 = vadd.f32 %v1652_v56, %v2065_v0  ;;  %1717 = vmatprep.subr.bf16.mxu0 %v1811_v49 }
  0xf5   : > { %v590_v51 = vpack.c.bf16 %v563_v48, %v562_v47  ;;  %v476_v57 = vadd.f32 %v2065_v0, %v475_v50  ;;  %v568_v6 = vmax.f32 %v484_v59, 0.0  ;;  %v527_v24 = vadd.f32 %v2065_v0, %v526_v2  ;;  %1718 = vmatpush3.bf16.msra.mxu0 %v1811_v49 }
  0xf6   : > { %v1640_v55 = vpop.f32.mrf.mxu0  ;;  %v1655_v15 = vpop.f32.mrf.mxu1  ;;  %v581_v41 = vmax.f32 %v535_v37, 0.0 }
  0xf7   : > { %v487_v58 = vadd.f32 %v1640_v55, %v2065_v0  ;;  %1681 = vmatprep.mubr.bf16.mxu1 %v590_v51  ;;  %v566_v3 = vmax.f32 %v476_v57, 0.0  ;;  %v579_v28 = vmax.f32 %v527_v24, 0.0  ;;  %v548_v44 = vadd.f32 %v1655_v15, %v2065_v0 }
  0xf8   : > { %v478_v60 = vpop.f32.mrf.mxu0  ;;  %1682 = vmatmul.mubr.bf16.gmra.mxu1 %v591_v54  ;;  %v539_v20 = vpop.f32.mrf.mxu1  ;;  %v599_v43 = vpack.c.bf16 %v581_v41, %v580_v39 }
  0xf9   : > { %v479_v62 = vadd.f32 %v2065_v0, %v478_v60  ;;  %v569_v1 = vmax.f32 %v487_v58, 0.0  ;;  %v598_v33 = vpack.c.bf16 %v579_v28, %v578_v27  ;;  %v540_v34 = vadd.f32 %v2065_v0, %v539_v20 }
  0xfa   : > { %v1656_v26 = vpop.f32.mrf.mxu1  ;;  %v584_v46 = vmax.f32 %v548_v44, 0.0 }
  0xfb   : > { %v567_v5 = vmax.f32 %v479_v62, 0.0  ;;  %v593_v12 = vpack.c.bf16 %v569_v1, %v568_v6  ;;  %v582_v31 = vmax.f32 %v540_v34, 0.0  ;;  %v551_v45 = vadd.f32 %v1656_v26, %v2065_v0 }
  0xfc   : > { %v542_v32 = vpop.f32.mrf.mxu1 }
  0xfd   : > { %v592_v7 = vpack.c.bf16 %v567_v5, %v566_v3  ;;  %v543_v35 = vadd.f32 %v2065_v0, %v542_v32  ;;  %v585_v47 = vmax.f32 %v551_v45, 0.0  ;;  %v1812_v0 = vld [vmem:[%s2274_s5] sm:$0xff]  }
  0xfe   : > { %1719 = vmatprep.subr.bf16.mxu0 %v1812_v0 }
  0xff   : > { %1685 = vmatprep.mubr.bf16.mxu1 %v592_v7  ;;  %v583_v38 = vmax.f32 %v543_v35, 0.0  ;;  %v601_v48 = vpack.c.bf16 %v585_v47, %v584_v46  ;;  %1720 = vmatpush3.bf16.msra.mxu0 %v1812_v0 }
 0x100   : > { %1686 = vmatmul.mubr.bf16.gmra.mxu1 %v593_v12 }
 0x101   : > { %1689 = vmatprep.mubr.bf16.mxu1 %v594_v8  ;;  %v600_v42 = vpack.c.bf16 %v583_v38, %v582_v31 }
 0x108   : > { %1690 = vmatmul.mubr.bf16.gmra.mxu1 %v595_v25 }
 0x109   : > { %1693 = vmatprep.mubr.bf16.mxu1 %v596_v21 }
 0x110   : > { %1694 = vmatmul.mubr.bf16.gmra.mxu1 %v597_v36 }
 0x111   : > { %1697 = vmatprep.mubr.bf16.mxu1 %v598_v33 }
 0x118   : > { %1698 = vmatmul.mubr.bf16.gmra.mxu1 %v599_v43 }
 0x119   : > { %1701 = vmatprep.mubr.bf16.mxu1 %v600_v42 }
 0x120   : > { %1702 = vmatmul.mubr.bf16.gmra.mxu1 %v601_v48 }
 0x1a8   : > { %v1675_v50 = vpop.f32.mrf.mxu1 }
 0x1a9   : > { %v716_v56 = vadd.f32 %v1675_v50, %v2126_v52 }
 0x1aa   : > { %v707_v51 = vpop.f32.mrf.mxu1 }
 0x1ab   : > { %v708_v54 = vadd.f32 %v2126_v52, %v707_v51  ;;  %v836_v63 = vmax.f32 %v716_v56, 0.0 }
 0x1ac   : > { %v1676_v53 = vpop.f32.mrf.mxu1 }
 0x1ad   : > { %v719_v55 = vadd.f32 %v1676_v53, %v2126_v52  ;;  %v834_v61 = vmax.f32 %v708_v54, 0.0 }
 0x1ae   : > { %v710_v57 = vpop.f32.mrf.mxu1 }
 0x1af   : > { %v711_v58 = vadd.f32 %v2126_v52, %v710_v57  ;;  %v837_v59 = vmax.f32 %v719_v55, 0.0 }
 0x1b0   : > { %v1679_v60 = vpop.f32.mrf.mxu1 }
 0x1b1   : > { %v835_v62 = vmax.f32 %v711_v58, 0.0  ;;  %v867_v3 = vpack.c.bf16 %v837_v59, %v836_v63  ;;  %v732_v8 = vadd.f32 %v1679_v60, %v2126_v52 }
 0x1b2   : > { %v723_v1 = vpop.f32.mrf.mxu1 }
 0x1b3   : > { %v866_v2 = vpack.c.bf16 %v835_v62, %v834_v61  ;;  %v724_v6 = vadd.f32 %v2126_v52, %v723_v1  ;;  %v840_v16 = vmax.f32 %v732_v8, 0.0 }
 0x1b4   : > { %v1680_v5 = vpop.f32.mrf.mxu1 }
 0x1b5   : > { %v735_v7 = vadd.f32 %v1680_v5, %v2126_v52  ;;  %1721 = vmatprep.mubr.bf16.mxu0 %v866_v2  ;;  %v838_v14 = vmax.f32 %v724_v6, 0.0 }
 0x1b6   : > { %v726_v9 = vpop.f32.mrf.mxu1  ;;  %1722 = vmatmul.mubr.bf16.vlgmr.msra.gmra.mxu0 %v867_v3 }
 0x1b7   : > { %v727_v10 = vadd.f32 %v2126_v52, %v726_v9  ;;  %v841_v11 = vmax.f32 %v735_v7, 0.0 }
 0x1b8   : > { %v1683_v12 = vpop.f32.mrf.mxu1 }
 0x1b9   : > { %v839_v15 = vmax.f32 %v727_v10, 0.0  ;;  %v869_v19 = vpack.c.bf16 %v841_v11, %v840_v16  ;;  %v748_v24 = vadd.f32 %v1683_v12, %v2126_v52 }
 0x1ba   : > { %v739_v17 = vpop.f32.mrf.mxu1 }
 0x1bb   : > { %v868_v18 = vpack.c.bf16 %v839_v15, %v838_v14  ;;  %v740_v21 = vadd.f32 %v2126_v52, %v739_v17  ;;  %v844_v29 = vmax.f32 %v748_v24, 0.0 }
 0x1bc   : > { %v1684_v20 = vpop.f32.mrf.mxu1 }
 0x1bd   : > { %v751_v23 = vadd.f32 %v1684_v20, %v2126_v52  ;;  %1725 = vmatprep.mubr.bf16.mxu0 %v868_v18  ;;  %v842_v27 = vmax.f32 %v740_v21, 0.0 }
 0x1be   : > { %v742_v25 = vpop.f32.mrf.mxu1  ;;  %1726 = vmatmul.mubr.bf16.gmra.mxu0 %v869_v19 }
 0x1bf   : > { %v743_v4 = vadd.f32 %v2126_v52, %v742_v25  ;;  %v845_v13 = vmax.f32 %v751_v23, 0.0 }
 0x1c0   : > { %v1687_v26 = vpop.f32.mrf.mxu1 }
 0x1c1   : > { %v843_v28 = vmax.f32 %v743_v4, 0.0  ;;  %v871_v33 = vpack.c.bf16 %v845_v13, %v844_v29  ;;  %v764_v22 = vadd.f32 %v1687_v26, %v2126_v52 }
 0x1c2   : > { %v755_v30 = vpop.f32.mrf.mxu1 }
 0x1c3   : > { %v870_v32 = vpack.c.bf16 %v843_v28, %v842_v27  ;;  %v756_v35 = vadd.f32 %v2126_v52, %v755_v30  ;;  %v848_v43 = vmax.f32 %v764_v22, 0.0 }
 0x1c4   : > { %v1688_v34 = vpop.f32.mrf.mxu1 }
 0x1c5   : > { %v767_v36 = vadd.f32 %v1688_v34, %v2126_v52  ;;  %1729 = vmatprep.mubr.bf16.mxu0 %v870_v32  ;;  %v846_v41 = vmax.f32 %v756_v35, 0.0 }
 0x1c6   : > { %v758_v37 = vpop.f32.mrf.mxu1  ;;  %1730 = vmatmul.mubr.bf16.gmra.mxu0 %v871_v33 }
 0x1c7   : > { %v759_v31 = vadd.f32 %v2126_v52, %v758_v37  ;;  %v849_v38 = vmax.f32 %v767_v36, 0.0 }
 0x1c8   : > { %v1691_v39 = vpop.f32.mrf.mxu1 }
 0x1c9   : > { %v847_v42 = vmax.f32 %v759_v31, 0.0  ;;  %v873_v46 = vpack.c.bf16 %v849_v38, %v848_v43  ;;  %v780_v49 = vadd.f32 %v1691_v39, %v2126_v52  ;;  %v2164_v38 = vld [vmem:[%s2275_s6] ss:$0 sm:$0xff] }
 0x1ca   : > { %v771_v44 = vpop.f32.mrf.mxu1 }
 0x1cb   : > { %v872_v45 = vpack.c.bf16 %v847_v42, %v846_v41  ;;  %v772_v48 = vadd.f32 %v2126_v52, %v771_v44  ;;  %v852_v56 = vmax.f32 %v780_v49, 0.0 }
 0x1cc   : > { %v1692_v47 = vpop.f32.mrf.mxu1 }
 0x1cd   : > { %v783_v40 = vadd.f32 %v1692_v47, %v2126_v52  ;;  %1733 = vmatprep.mubr.bf16.mxu0 %v872_v45  ;;  %v850_v54 = vmax.f32 %v772_v48, 0.0 }
 0x1ce   : > { %v774_v0 = vpop.f32.mrf.mxu1  ;;  %1734 = vmatmul.mubr.bf16.gmra.mxu0 %v873_v46 }
 0x1cf   : > { %v775_v50 = vadd.f32 %v2126_v52, %v774_v0  ;;  %v853_v51 = vmax.f32 %v783_v40, 0.0 }
 0x1d0   : > { %v1695_v53 = vpop.f32.mrf.mxu1 }
 0x1d1   : > { %v851_v55 = vmax.f32 %v775_v50, 0.0  ;;  %v875_v59 = vpack.c.bf16 %v853_v51, %v852_v56  ;;  %v796_v63 = vadd.f32 %v1695_v53, %v2126_v52 }
 0x1d2   : > { %v787_v57 = vpop.f32.mrf.mxu1 }
 0x1d3   : > { %v874_v58 = vpack.c.bf16 %v851_v55, %v850_v54  ;;  %v788_v61 = vadd.f32 %v2126_v52, %v787_v57  ;;  %v856_v8 = vmax.f32 %v796_v63, 0.0 }
 0x1d4   : > { %v1696_v60 = vpop.f32.mrf.mxu1 }
 0x1d5   : > { %v799_v62 = vadd.f32 %v1696_v60, %v2126_v52  ;;  %1737 = vmatprep.mubr.bf16.mxu0 %v874_v58  ;;  %v854_v6 = vmax.f32 %v788_v61, 0.0 }
 0x1d6   : > { %v790_v1 = vpop.f32.mrf.mxu1  ;;  %1738 = vmatmul.mubr.bf16.gmra.mxu0 %v875_v59 }
 0x1d7   : > { %v791_v2 = vadd.f32 %v2126_v52, %v790_v1  ;;  %v857_v3 = vmax.f32 %v799_v62, 0.0 }
 0x1d8   : > { %v1699_v5 = vpop.f32.mrf.mxu1 }
 0x1d9   : > { %v855_v7 = vmax.f32 %v791_v2, 0.0  ;;  %v877_v11 = vpack.c.bf16 %v857_v3, %v856_v8  ;;  %v812_v16 = vadd.f32 %v1699_v5, %v2126_v52 }
 0x1da   : > { %v803_v9 = vpop.f32.mrf.mxu1 }
 0x1db   : > { %v876_v10 = vpack.c.bf16 %v855_v7, %v854_v6  ;;  %v804_v14 = vadd.f32 %v2126_v52, %v803_v9  ;;  %v860_v24 = vmax.f32 %v812_v16, 0.0 }
 0x1dc   : > { %v1700_v12 = vpop.f32.mrf.mxu1 }
 0x1dd   : > { %v815_v15 = vadd.f32 %v1700_v12, %v2126_v52  ;;  %1741 = vmatprep.mubr.bf16.mxu0 %v876_v10  ;;  %v858_v21 = vmax.f32 %v804_v14, 0.0 }
 0x1de   : > { %v806_v17 = vpop.f32.mrf.mxu1  ;;  %1742 = vmatmul.mubr.bf16.gmra.mxu0 %v877_v11 }
 0x1df   : > { %v807_v18 = vadd.f32 %v2126_v52, %v806_v17  ;;  %v861_v19 = vmax.f32 %v815_v15, 0.0 }
 0x1e0   : > { %v1703_v20 = vpop.f32.mrf.mxu1 }
 0x1e1   : > { %v859_v23 = vmax.f32 %v807_v18, 0.0  ;;  %v879_v13 = vpack.c.bf16 %v861_v19, %v860_v24  ;;  %v828_v29 = vadd.f32 %v1703_v20, %v2126_v52 }
 0x1e2   : > { %v819_v25 = vpop.f32.mrf.mxu1 }
 0x1e3   : > { %v878_v4 = vpack.c.bf16 %v859_v23, %v858_v21  ;;  %v820_v27 = vadd.f32 %v2126_v52, %v819_v25  ;;  %v864_v36 = vmax.f32 %v828_v29, 0.0 }
 0x1e4   : > { %v1704_v26 = vpop.f32.mrf.mxu1 }
 0x1e5   : > { %v831_v28 = vadd.f32 %v1704_v26, %v2126_v52  ;;  %1745 = vmatprep.mubr.bf16.mxu0 %v878_v4  ;;  %v862_v34 = vmax.f32 %v820_v27, 0.0 }
 0x1e6   : > { %v822_v30 = vpop.f32.mrf.mxu1  ;;  %1746 = vmatmul.mubr.bf16.gmra.mxu0 %v879_v13 }
 0x1e7   : > { %v823_v32 = vadd.f32 %v2126_v52, %v822_v30  ;;  %v865_v33 = vmax.f32 %v831_v28, 0.0 }
 0x1e9   : > { %v863_v35 = vmax.f32 %v823_v32, 0.0  ;;  %v881_v37 = vpack.c.bf16 %v865_v33, %v864_v36 }
 0x1eb   : > { %v880_v22 = vpack.c.bf16 %v863_v35, %v862_v34 }
 0x1ed   : > { %1749 = vmatprep.mubr.bf16.mxu0 %v880_v22 }
 0x1ee   : > { %1750 = vmatmul.mubr.bf16.gmra.mxu0 %v881_v37 }
 0x276   : > { %v1723_v31 = vpop.f32.mrf.mxu0 }
 0x277   : > { %v996_v52 = vadd.f32 %v1723_v31, %v2164_v38 }
 0x278   : > { %v987_v39 = vpop.f32.mrf.mxu0 }
 0x279   : > { %v988_v44 = vadd.f32 %v2164_v38, %v987_v39 }
 0x27a   : > { %v1724_v41 = vpop.f32.mrf.mxu0 }
 0x27b   : > { %v999_v42 = vadd.f32 %v1724_v41, %v2164_v38 }
 0x27c   : > { %v990_v43 = vpop.f32.mrf.mxu0 }
 0x27d   : > { %v1471_v45 = vpack.c.bf16 %v999_v42, %v996_v52  ;;  %v991_v46 = vadd.f32 %v2164_v38, %v990_v43 }
 0x27e   : > { %v1727_v47 = vpop.f32.mrf.mxu0 }
 0x27f   : > { %1543 = vst [vmem:[%s2172_s18 + $0x8] sm:$0xff] %v1471_v45   ;;  %v1466_v48 = vpack.c.bf16 %v991_v46, %v988_v44  ;;  %v1012_v0 = vadd.f32 %v1727_v47, %v2164_v38 }
 0x280   : > { %v1003_v40 = vpop.f32.mrf.mxu0 }
 0x281   : > { %1467 = vst [vmem:[%s2172_s18] sm:$0xff] %v1466_v48   ;;  %v1004_v53 = vadd.f32 %v2164_v38, %v1003_v40 }
 0x282   : > { %v1728_v49 = vpop.f32.mrf.mxu0 }
 0x283   : > { %v1015_v50 = vadd.f32 %v1728_v49, %v2164_v38 }
 0x284   : > { %v1006_v51 = vpop.f32.mrf.mxu0 }
 0x285   : > { %v1481_v54 = vpack.c.bf16 %v1015_v50, %v1012_v0  ;;  %v1007_v55 = vadd.f32 %v2164_v38, %v1006_v51 }
 0x286   : > { %v1731_v56 = vpop.f32.mrf.mxu0 }
 0x287   : > { %1545 = vst [vmem:[%s2172_s18 + $0x18] sm:$0xff] %v1481_v54   ;;  %v1476_v57 = vpack.c.bf16 %v1007_v55, %v1004_v53  ;;  %v1028_v60 = vadd.f32 %v1731_v56, %v2164_v38 }
 0x288   : > { %v1019_v58 = vpop.f32.mrf.mxu0 }
 0x289   : > { %1544 = vst [vmem:[%s2172_s18 + $0x10] sm:$0xff] %v1476_v57   ;;  %v1020_v63 = vadd.f32 %v2164_v38, %v1019_v58 }
 0x28a   : > { %v1732_v59 = vpop.f32.mrf.mxu0 }
 0x28b   : > { %v1031_v61 = vadd.f32 %v1732_v59, %v2164_v38 }
 0x28c   : > { %v1022_v62 = vpop.f32.mrf.mxu0 }
 0x28d   : > { %v1491_v1 = vpack.c.bf16 %v1031_v61, %v1028_v60  ;;  %v1023_v2 = vadd.f32 %v2164_v38, %v1022_v62 }
 0x28e   : > { %v1735_v3 = vpop.f32.mrf.mxu0 }
 0x28f   : > { %1547 = vst [vmem:[%s2172_s18 + $0x28] sm:$0xff] %v1491_v1   ;;  %v1486_v5 = vpack.c.bf16 %v1023_v2, %v1020_v63  ;;  %v1044_v8 = vadd.f32 %v1735_v3, %v2164_v38 }
 0x290   : > { %v1035_v6 = vpop.f32.mrf.mxu0 }
 0x291   : > { %1546 = vst [vmem:[%s2172_s18 + $0x20] sm:$0xff] %v1486_v5   ;;  %v1036_v11 = vadd.f32 %v2164_v38, %v1035_v6 }
 0x292   : > { %v1736_v7 = vpop.f32.mrf.mxu0 }
 0x293   : > { %v1047_v9 = vadd.f32 %v1736_v7, %v2164_v38 }
 0x294   : > { %v1038_v10 = vpop.f32.mrf.mxu0 }
 0x295   : > { %v1501_v12 = vpack.c.bf16 %v1047_v9, %v1044_v8  ;;  %v1039_v14 = vadd.f32 %v2164_v38, %v1038_v10 }
 0x296   : > { %v1739_v15 = vpop.f32.mrf.mxu0 }
 0x297   : > { %1549 = vst [vmem:[%s2172_s18 + $0x38] sm:$0xff] %v1501_v12   ;;  %v1496_v16 = vpack.c.bf16 %v1039_v14, %v1036_v11  ;;  %v1060_v19 = vadd.f32 %v1739_v15, %v2164_v38 }
 0x298   : > { %v1051_v17 = vpop.f32.mrf.mxu0 }
 0x299   : > { %1548 = vst [vmem:[%s2172_s18 + $0x30] sm:$0xff] %v1496_v16   ;;  %v1052_v23 = vadd.f32 %v2164_v38, %v1051_v17 }
 0x29a   : > { %v1740_v18 = vpop.f32.mrf.mxu0 }
 0x29b   : > { %v1063_v20 = vadd.f32 %v1740_v18, %v2164_v38 }
 0x29c   : > { %v1054_v21 = vpop.f32.mrf.mxu0 }
 0x29d   : > { %v1511_v24 = vpack.c.bf16 %v1063_v20, %v1060_v19  ;;  %v1055_v25 = vadd.f32 %v2164_v38, %v1054_v21 }
 0x29e   : > { %v1743_v4 = vpop.f32.mrf.mxu0 }
 0x29f   : > { %1551 = vst [vmem:[%s2172_s18 + $0x48] sm:$0xff] %v1511_v24   ;;  %v1506_v13 = vpack.c.bf16 %v1055_v25, %v1052_v23  ;;  %v1076_v28 = vadd.f32 %v1743_v4, %v2164_v38 }
 0x2a0   : > { %v1067_v26 = vpop.f32.mrf.mxu0 }
 0x2a1   : > { %1550 = vst [vmem:[%s2172_s18 + $0x40] sm:$0xff] %v1506_v13   ;;  %v1068_v32 = vadd.f32 %v2164_v38, %v1067_v26 }
 0x2a2   : > { %v1744_v27 = vpop.f32.mrf.mxu0 }
 0x2a3   : > { %v1079_v29 = vadd.f32 %v1744_v27, %v2164_v38 }
 0x2a4   : > { %v1070_v30 = vpop.f32.mrf.mxu0 }
 0x2a5   : > { %v1521_v33 = vpack.c.bf16 %v1079_v29, %v1076_v28  ;;  %v1071_v34 = vadd.f32 %v2164_v38, %v1070_v30 }
 0x2a6   : > { %v1747_v35 = vpop.f32.mrf.mxu0 }
 0x2a7   : > { %1553 = vst [vmem:[%s2172_s18 + $0x58] sm:$0xff] %v1521_v33   ;;  %v1516_v36 = vpack.c.bf16 %v1071_v34, %v1068_v32  ;;  %v1092_v31 = vadd.f32 %v1747_v35, %v2164_v38 }
 0x2a8   : > { %v1083_v22 = vpop.f32.mrf.mxu0 }
 0x2a9   : > { %1552 = vst [vmem:[%s2172_s18 + $0x50] sm:$0xff] %v1516_v36   ;;  %v1084_v52 = vadd.f32 %v2164_v38, %v1083_v22 }
 0x2aa   : > { %v1748_v37 = vpop.f32.mrf.mxu0 }
 0x2ab   : > { %v1095_v39 = vadd.f32 %v1748_v37, %v2164_v38 }
 0x2ac   : > { %v1086_v41 = vpop.f32.mrf.mxu0 }
 0x2ad   : > { %v1531_v42 = vpack.c.bf16 %v1095_v39, %v1092_v31  ;;  %v1087_v43 = vadd.f32 %v2164_v38, %v1086_v41 }
 0x2ae   : > { %v1751_v44 = vpop.f32.mrf.mxu0 }
 0x2af   : > { %1555 = vst [vmem:[%s2172_s18 + $0x68] sm:$0xff] %v1531_v42   ;;  %v1526_v45 = vpack.c.bf16 %v1087_v43, %v1084_v52  ;;  %v1108_v48 = vadd.f32 %v1751_v44, %v2164_v38 }
 0x2b0   : > { %v1099_v46 = vpop.f32.mrf.mxu0 }
 0x2b1   : > { %1554 = vst [vmem:[%s2172_s18 + $0x60] sm:$0xff] %v1526_v45   ;;  %v1100_v0 = vadd.f32 %v2164_v38, %v1099_v46 }
 0x2b2   : > { %v1752_v47 = vpop.f32.mrf.mxu0 }
 0x2b3   : > { %v1111_v40 = vadd.f32 %v1752_v47, %v2164_v38 }
 0x2b4   : > { %v1102_v49 = vpop.f32.mrf.mxu0 }
 0x2b5   : > { %v1541_v50 = vpack.c.bf16 %v1111_v40, %v1108_v48  ;;  %v1103_v51 = vadd.f32 %v2164_v38, %v1102_v49 }
 0x2b7   : > { %1557 = vst [vmem:[%s2172_s18 + $0x78] sm:$0xff] %v1541_v50   ;;  %v1536_v53 = vpack.c.bf16 %v1103_v51, %v1100_v0 }
 0x2b9   : > { %1556 = vst [vmem:[%s2172_s18 + $0x70] sm:$0xff] %v1536_v53  }
 0x2ba   : > { %1826 = shalt.err (!%p1823_p3)
}
 0x2bb   : > { %s1827_s14 = scalar_lea.hbm %s2221_s23, 2048  ;;  %s1831_s17 = scalar_lea.hbm %s2276_s7, 8192 }
 0x2bc   : > { %p1828_p4 = scmp.ne.s32.totalorder %s2221_s23, %s1827_s14  ;;  %p1832_p9 = scmp.lt.s32.totalorder %s2221_s23, %s2276_s7 }
 0x2bd   : > { %p1833_p10 = scmp.lt.s32.totalorder %s1831_s17, %s1827_s14 }
 0x2be   : > { %p1829_p7 = pnand %p1828_p4, %p1956_p5 }
 0x2bf   : > { %p1834_p11 = por %p1833_p10, %p1832_p9 }
 0x2c0   : > { %p1830_p8 = pneg %p1829_p7 }
 0x2c2   : > { %p1835_p12 = pnand %p1834_p11, %p1830_p8 }
 0x2c4   : > { %1838 = shalt.err (!%p1835_p12)
}
 0x2c5   : > { %s1876_s21 = smov 64   ;;  %s1877_s22 = smov 4  }
 0x2c6   : > { %1755 = dma.vmem_to_hbm [thread:$0]  (%p1956_p5), %s2223_s20, 2048, %s2221_s23, %s2229_s28, %s1876_s21, %s1876_s21, %s1877_s22  }
 0x2c7 PF: > { %p1761_p13 = scmp.ge.s32.totalorder %s1873_s27, 2  ;;  %s1303_s29 = sand.u32 1, %s1861_s24  }
 0x2c8   : > { %s1304_s8 = scalar_lea.sflag [#allocation3], %s1303_s29 }
 0x2c9   : > { %p1758_p0 = pnand %p1761_p13, %p1960_p6 }
 0x2cb   : > { %p1759_p1 = pneg %p1758_p0 }
 0x2cd   : > { %1856 = dma.done.wait (%p1759_p1), %s1304_s8, 2048  }
 0x2ce   : > { %1858 = vsyncadd (%p1759_p1), %s1304_s8, 4294965248  ;;  %p17_p2 = scmp.ge.s32.totalorder %s1943_s30, 6   ;;  %s2279_s24 = smov %s1865_s25 }
 0x2cf   : > { %s2280_s25 = smov %s1869_s26  ;;  %s2281_s26 = smov %s1954_s10 }
 0x2d0   : > { %s2282_s27 = smov %s1943_s30  ;;  %19 = sbr.rel (!%p17_p2) target bundleno = 3 (0x3), region = 83 }
 0x2d5   :  { %1309 = vsyncpa [#allocation3], 1 }
 0x2d6   :  { %1311 = vsyncpa [#allocation3 + $0x1], 1 }

</bundles_post_ra>
